<compile_context>
chip_gen: v6e
topology: v6e:2x2x1
jax: 0.10.0
libtpu: 0.0.40
codegen_flags: <defaults>
</compile_context>

<pallas_src>
import functools

import jax
import jax.numpy as jnp
from jax import lax
from jax.experimental import pallas as pl
from jax.experimental.pallas import tpu as pltpu


# ---------------------------------------------------------------------------
# Pass 1: pooled mean -> fc1 -> relu -> fc2 -> sigmoid  =>  gates (B, C, 1)
# ---------------------------------------------------------------------------
def se_reduce_kernel(x_ref, w1_ref, w2_ref, gates_ref, acc_ref,
                     *, inv_l, tl, true_l, ragged):
    k = pl.program_id(1)                              # reduction axis (last)

    @pl.when(k == 0)
    def _init():
        acc_ref[...] = jnp.zeros_like(acc_ref)

    x = x_ref[...]                                    # (1, C, TL), native dtype
    if ragged:
        # Mask lanes past the true length (tail tile is zero-padded).
        lane = lax.broadcasted_iota(jnp.int32, x.shape, dimension=2)
        valid = (k * tl + lane) < true_l
        x = jnp.where(valid, x, jnp.zeros_like(x))

    # Per-step partial sum; only the tiny (1, C) accumulator is f32.  The
    # per-step cross-lane reduce is C/8 vregs of XLU work and stays far off
    # the DMA-bound critical path on all generations.
    acc_ref[...] += jnp.sum(x, axis=-1, dtype=jnp.float32)

    @pl.when(k == pl.num_programs(1) - 1)
    def _finalize():
        se = acc_ref[...] * inv_l                                  # (1, C) f32
        w1 = w1_ref[...].astype(jnp.float32)                       # (H, C)
        w2 = w2_ref[...].astype(jnp.float32)                       # (C, H)
        # H = C // reduction is tiny -> do the two FCs as broadcast-mul +
        # lane reduce on the VPU/XLU (robust lowering, negligible cost).
        h = jnp.sum(se[:, None, :] * w1[None, :, :], axis=-1)      # (1, H)
        h = jnp.maximum(h, 0.0)
        s = jnp.sum(h[:, None, :] * w2[None, :, :], axis=-1)       # (1, C)
        # Sublane-major gate layout (C on sublanes, single lane) so pass 2's
        # broadcast multiply needs no per-step relayout.
        gates_ref[...] = jax.nn.sigmoid(s)[:, :, None]             # (1, C, 1)


# ---------------------------------------------------------------------------
# Pass 2: channel-wise rescale  out = x * gates (broadcast over L)
# ---------------------------------------------------------------------------
def se_scale_kernel(gates_ref, x_ref, o_ref):
    x = x_ref[...]                                   # (B, C, TL2), native dtype
    g = gates_ref[...].astype(x.dtype)               # (B, C, 1), resident
    o_ref[...] = x * g


# ---------------------------------------------------------------------------
# Tiling / VMEM policy
# ---------------------------------------------------------------------------
def _vmem_capacity_bytes():
    """Physical VMEM per core; 128 MiB on v5e/v6e, 64 MiB on v7x."""
    try:
        cap = int(pltpu.get_tpu_info().vmem_capacity_bytes)
        if cap > 0:
            return cap
    except Exception:
        pass
    try:
        if "v7" in jax.devices()[0].device_kind.lower():
            return 64 * 1024 * 1024
    except Exception:
        pass
    return 128 * 1024 * 1024


def _pick_l_tile(L, bytes_per_lane, budget_bytes):
    """Largest lane tile whose block fits the budget.  Returns either the
    full L (single step, any L allowed) or a multiple of 128 (< L), so the
    BlockSpec (8, 128) rule is always satisfied and the tail, if any, is
    handled by masking / write clipping."""
    if L * bytes_per_lane <= budget_bytes:
        return L
    tl = (budget_bytes // max(1, bytes_per_lane)) // 128 * 128
    tl = max(tl, 128)
    if tl >= L:
        return L
    return tl


def se_block(x, w1, w2, *, donate_x=False, l_tile_budget_bytes=None):
    B, C, L = x.shape
    H = w1.shape[0]
    itemsize = jnp.dtype(x.dtype).itemsize

    vmem_cap = _vmem_capacity_bytes()
    small_vmem = vmem_cap < 100 * 1024 * 1024          # v7x (64 MiB physical)
    # ~8 MiB blocks on v7x, ~16 MiB on v5e/v6e (pass 2 working set is ~4x the
    # block: in + out, each double-buffered).
    budget = l_tile_budget_bytes or ((8 if small_vmem else 16) * 1024 * 1024)
    # 48 MiB scoped on v7x, 96 MiB on v5e/v6e (v5e default of 16 MiB would
    # otherwise reject the larger tiles).
    vmem_limit = max(32 * 1024 * 1024,
                     min((vmem_cap * 3) // 4, 100 * 1024 * 1024))

    # -------------------- Pass 1: reduction over (B, L) --------------------
    # Block is (1, C, TL1); per-b tiles so the batch axis can megacore-shard.
    # TODO(synk): for B == 1 on v7x, split L across the two cores instead and
    # combine the two partial sums in the epilogue.
    TL1 = _pick_l_tile(L, C * itemsize, budget)
    num_l1 = pl.cdiv(L, TL1)
    ragged1 = (L % TL1) != 0

    gates = pl.pallas_call(
        functools.partial(se_reduce_kernel, inv_l=1.0 / L, tl=TL1,
                          true_l=L, ragged=ragged1),
        out_shape=jax.ShapeDtypeStruct((B, C, 1), jnp.float32),
        grid=(B, num_l1),
        in_specs=[
            pl.BlockSpec((1, C, TL1), lambda b, k: (b, 0, k)),
            pl.BlockSpec((H, C), lambda b, k: (0, 0)),
            pl.BlockSpec((C, H), lambda b, k: (0, 0)),
        ],
        out_specs=pl.BlockSpec((1, C, 1), lambda b, k: (b, 0, 0)),
        scratch_shapes=[pltpu.VMEM((1, C), jnp.float32)],
        compiler_params=pltpu.CompilerParams(
            dimension_semantics=("parallel", "arbitrary"),
            vmem_limit_bytes=vmem_limit),
        cost_estimate=pl.CostEstimate(
            flops=int(B * C * L + 4 * B * C * H),
            transcendentals=int(B * C),
            bytes_accessed=int(B * C * L * itemsize + 2 * C * H * 4
                               + B * C * 4)),
    )(x, w1, w2)

    # ---------------- Pass 2: lane-dense rescale over L tiles ---------------
    # Block is (B, C, TL2); one grid axis -> B x fewer steps, megacore still
    # shards L on v7x, and the gates stay resident across the whole grid.
    TL2 = _pick_l_tile(L, B * C * itemsize, budget)
    num_l2 = pl.cdiv(L, TL2)

    out = pl.pallas_call(
        se_scale_kernel,
        out_shape=jax.ShapeDtypeStruct((B, C, L), x.dtype),
        grid=(num_l2,),
        in_specs=[
            pl.BlockSpec((B, C, 1), lambda k: (0, 0, 0)),      # gates, resident
            pl.BlockSpec((B, C, TL2), lambda k: (0, 0, k)),    # x tile
        ],
        out_specs=pl.BlockSpec((B, C, TL2), lambda k: (0, 0, k)),
        input_output_aliases=({1: 0} if donate_x else {}),
        compiler_params=pltpu.CompilerParams(
            dimension_semantics=("parallel",),
            vmem_limit_bytes=vmem_limit),
        cost_estimate=pl.CostEstimate(
            flops=int(B * C * L),
            transcendentals=0,
            bytes_accessed=int(2 * B * C * L * itemsize + B * C * 4)),
    )(gates, x)
    return out


def se_block_ref(x, w1, w2):
    # Pure-JAX reference mirroring the PyTorch forward.
    se = jnp.mean(x.astype(jnp.float32), axis=-1)        # (B, C)
    h = jnp.maximum(se @ w1.astype(jnp.float32).T, 0.0)  # (B, H)
    s = jax.nn.sigmoid(h @ w2.astype(jnp.float32).T)     # (B, C)
    return (x * s[:, :, None].astype(x.dtype)).astype(x.dtype)


if __name__ == "__main__":
    root = jax.random.PRNGKey(0)
    reduction = 16

    # --- 1) Small demo shape matching the PyTorch module defaults ----------
    B, C, L = 2, 32, 16
    H = C // reduction
    kx, k1, k2, rest = jax.random.split(root, 4)
    x = jax.random.normal(kx, (B, C, L), dtype=jnp.float32)
    w1 = jax.random.normal(k1, (H, C), dtype=jnp.float32) * 0.1   # fc1.weight
    w2 = jax.random.normal(k2, (C, H), dtype=jnp.float32) * 0.1   # fc2.weight

    out = jax.block_until_ready(se_block(x, w1, w2))
    ref = se_block_ref(x, w1, w2)
    assert out.shape == (B, C, L)
    assert jnp.allclose(out, ref, atol=1e-5, rtol=1e-5), "mismatch (small)"

    # --- 2) Larger shape, default generation-aware tiles (single big tile) --
    B2, C2, L2 = 2, 128, 4096
    H2 = C2 // reduction
    kx2, k12, k22, rest = jax.random.split(rest, 4)
    x2 = jax.random.normal(kx2, (B2, C2, L2), dtype=jnp.float32)
    w12 = jax.random.normal(k12, (H2, C2), dtype=jnp.float32) * 0.05
    w22 = jax.random.normal(k22, (C2, H2), dtype=jnp.float32) * 0.05

    out2 = jax.block_until_ready(se_block(x2, w12, w22))
    ref2 = se_block_ref(x2, w12, w22)
    assert out2.shape == (B2, C2, L2)
    assert jnp.allclose(out2, ref2, atol=1e-4, rtol=1e-4), "mismatch (large)"

    # --- 3) Ragged L (not a multiple of 128) with forced small tiles to
    #        exercise the masked multi-step reduction and clipped tail stores.
    B3, C3, L3 = 2, 128, 1000
    H3 = C3 // reduction
    kx3, k13, k23, _ = jax.random.split(rest, 4)
    x3 = jax.random.normal(kx3, (B3, C3, L3), dtype=jnp.float32)
    w13 = jax.random.normal(k13, (H3, C3), dtype=jnp.float32) * 0.05
    w23 = jax.random.normal(k23, (C3, H3), dtype=jnp.float32) * 0.05

    out3 = jax.block_until_ready(
        se_block(x3, w13, w23, l_tile_budget_bytes=256 * 1024))
    ref3 = se_block_ref(x3, w13, w23)
    assert out3.shape == (B3, C3, L3)
    assert jnp.allclose(out3, ref3, atol=1e-4, rtol=1e-4), "mismatch (ragged)"

    print("KERNEL_OK")
</pallas_src>

<mosaic_0001>
module attributes {stable_mosaic.version = 11 : i64} {
  func.func @se_reduce_kernel(%arg0: i32, %arg1: i32, %arg2: memref<1x32x16xf32, #tpu.memory_space<vmem>>, %arg3: memref<2x32xf32, #tpu.memory_space<vmem>>, %arg4: memref<32x2xf32, #tpu.memory_space<vmem>>, %arg5: memref<1x32x1xf32, #tpu.memory_space<vmem>>, %arg6: memref<1x32xf32, #tpu.memory_space<vmem>>) attributes {dimension_semantics = [#tpu.dimension_semantics<parallel>, #tpu.dimension_semantics<arbitrary>], iteration_bounds = array<i64: 2, 1>, scalar_prefetch = 0 : i64, scratch_operands = 1 : i64, tpu.core_type = #tpu.core_type<tc>, window_params = [{transform_indices = @transform_0, window_bounds = array<i64: 1, 32, 16>}, {pipeline_mode = #tpu.pipeline_mode<synchronous>, transform_indices = @transform_1, window_bounds = array<i64: 2, 32>}, {pipeline_mode = #tpu.pipeline_mode<synchronous>, transform_indices = @transform_2, window_bounds = array<i64: 32, 2>}, {transform_indices = @transform_3, window_bounds = array<i64: 1, 32, 1>}]} {
    %c0_i32 = arith.constant 0 : i32
    %0 = arith.cmpi eq, %arg1, %c0_i32 : i32
    %1 = arith.extui %0 : i1 to i32
    %c0_i32_0 = arith.constant 0 : i32
    %2 = arith.cmpi ne, %1, %c0_i32_0 : i32
    scf.if %2 {
      %cst_9 = arith.constant 0.000000e+00 : f32
      %11 = vector.broadcast %cst_9 : f32 to vector<1x32xf32>
      %c0_10 = arith.constant 0 : index
      %c0_11 = arith.constant 0 : index
      %12 = vector.load %arg6[%c0_10, %c0_11] : memref<1x32xf32, #tpu.memory_space<vmem>>, vector<1x32xf32>
      tpu.vector_store %arg6[%c0_10, %c0_11], %11 {strides = array<i32>} : memref<1x32xf32, #tpu.memory_space<vmem>>, vector<1x32xf32>,
    } else {
    }
    %c0 = arith.constant 0 : index
    %c0_1 = arith.constant 0 : index
    %c0_2 = arith.constant 0 : index
    %3 = vector.load %arg2[%c0, %c0_1, %c0_2] : memref<1x32x16xf32, #tpu.memory_space<vmem>>, vector<1x32x16xf32>
    %c0_3 = arith.constant 0 : index
    %c0_4 = arith.constant 0 : index
    %4 = vector.load %arg6[%c0_3, %c0_4] : memref<1x32xf32, #tpu.memory_space<vmem>>, vector<1x32xf32>
    %cst = arith.constant dense<0.000000e+00> : vector<1x32xf32>
    %5 = vector.multi_reduction <add>, %3, %cst [2] : vector<1x32x16xf32> to vector<1x32xf32>
    %6 = arith.addf %4, %5 : vector<1x32xf32>
    %c0_5 = arith.constant 0 : index
    %c0_6 = arith.constant 0 : index
    %7 = vector.load %arg6[%c0_5, %c0_6] : memref<1x32xf32, #tpu.memory_space<vmem>>, vector<1x32xf32>
    tpu.vector_store %arg6[%c0_5, %c0_6], %6 {strides = array<i32>} : memref<1x32xf32, #tpu.memory_space<vmem>>, vector<1x32xf32>,
    %c0_i32_7 = arith.constant 0 : i32
    %8 = arith.cmpi eq, %arg1, %c0_i32_7 : i32
    %9 = arith.extui %8 : i1 to i32
    %c0_i32_8 = arith.constant 0 : i32
    %10 = arith.cmpi ne, %9, %c0_i32_8 : i32
    scf.if %10 {
      %c0_9 = arith.constant 0 : index
      %c0_10 = arith.constant 0 : index
      %11 = vector.load %arg6[%c0_9, %c0_10] : memref<1x32xf32, #tpu.memory_space<vmem>>, vector<1x32xf32>
      %cst_11 = arith.constant 6.250000e-02 : f32
      %12 = vector.broadcast %cst_11 : f32 to vector<1x32xf32>
      %13 = arith.mulf %11, %12 : vector<1x32xf32>
      %c0_12 = arith.constant 0 : index
      %c0_13 = arith.constant 0 : index
      %14 = vector.load %arg3[%c0_12, %c0_13] : memref<2x32xf32, #tpu.memory_space<vmem>>, vector<2x32xf32>
      %c0_14 = arith.constant 0 : index
      %c0_15 = arith.constant 0 : index
      %15 = vector.load %arg4[%c0_14, %c0_15] : memref<32x2xf32, #tpu.memory_space<vmem>>, vector<32x2xf32>
      %16 = vector.shape_cast %13 : vector<1x32xf32> to vector<1x1x32xf32>
      %17 = vector.shape_cast %14 : vector<2x32xf32> to vector<1x2x32xf32>
      %18 = vector.broadcast %16 : vector<1x1x32xf32> to vector<1x2x32xf32>
      %19 = arith.mulf %18, %17 : vector<1x2x32xf32>
      %cst_16 = arith.constant dense<0.000000e+00> : vector<1x2xf32>
      %20 = vector.multi_reduction <add>, %19, %cst_16 [2] : vector<1x2x32xf32> to vector<1x2xf32>
      %cst_17 = arith.constant 0.000000e+00 : f32
      %21 = vector.broadcast %cst_17 : f32 to vector<1x2xf32>
      %22 = arith.maximumf %20, %21 : vector<1x2xf32>
      %23 = vector.shape_cast %22 : vector<1x2xf32> to vector<1x1x2xf32>
      %24 = vector.shape_cast %15 : vector<32x2xf32> to vector<1x32x2xf32>
      %25 = vector.broadcast %23 : vector<1x1x2xf32> to vector<1x32x2xf32>
      %26 = arith.mulf %25, %24 : vector<1x32x2xf32>
      %cst_18 = arith.constant dense<0.000000e+00> : vector<1x32xf32>
      %27 = vector.multi_reduction <add>, %26, %cst_18 [2] : vector<1x32x2xf32> to vector<1x32xf32>
      %28 = arith.negf %27 : vector<1x32xf32>
      %29 = math.exp %28 : vector<1x32xf32>
      %cst_19 = arith.constant 1.000000e+00 : f32
      %30 = vector.broadcast %cst_19 : f32 to vector<1x32xf32>
      %31 = arith.addf %30, %29 : vector<1x32xf32>
      %32 = arith.divf %30, %31 : vector<1x32xf32>
      %33 = vector.shape_cast %32 : vector<1x32xf32> to vector<1x32x1xf32>
      %c0_20 = arith.constant 0 : index
      %c0_21 = arith.constant 0 : index
      %c0_22 = arith.constant 0 : index
      %34 = vector.load %arg5[%c0_20, %c0_21, %c0_22] : memref<1x32x1xf32, #tpu.memory_space<vmem>>, vector<1x32x1xf32>
      tpu.vector_store %arg5[%c0_20, %c0_21, %c0_22], %33 {strides = array<i32>} : memref<1x32x1xf32, #tpu.memory_space<vmem>>, vector<1x32x1xf32>,
    } else {
    }
    return
  }
  func.func @transform_0(%arg0: i32, %arg1: i32) -> (i32, i32, i32) {
    %c0_i32 = arith.constant 0 : i32
    %c0_i32_0 = arith.constant 0 : i32
    return %arg0, %c0_i32, %arg1 : i32, i32, i32
  }
  func.func @transform_1(%arg0: i32, %arg1: i32) -> (i32, i32) {
    %c0_i32 = arith.constant 0 : i32
    %c0_i32_0 = arith.constant 0 : i32
    %c0_i32_1 = arith.constant 0 : i32
    return %c0_i32, %c0_i32_0 : i32, i32
  }
  func.func @transform_2(%arg0: i32, %arg1: i32) -> (i32, i32) {
    %c0_i32 = arith.constant 0 : i32
    %c0_i32_0 = arith.constant 0 : i32
    %c0_i32_1 = arith.constant 0 : i32
    return %c0_i32, %c0_i32_0 : i32, i32
  }
  func.func @transform_3(%arg0: i32, %arg1: i32) -> (i32, i32, i32) {
    %c0_i32 = arith.constant 0 : i32
    %c0_i32_0 = arith.constant 0 : i32
    %c0_i32_1 = arith.constant 0 : i32
    return %arg0, %c0_i32, %c0_i32_0 : i32, i32, i32
  }
}

</mosaic_0001>

<bundles_post_ra>
// kernel: tpu_custom_call.1
= control target key start
LH: loop header
LB: loop body
LE: loop exit
PB: predicated region body
PF: predicated region fallthrough
CT: control target
= control target key end

     0   :  { %s1432_s12 = smov 0   ;;  %s1434_s13 = smov 0   ;;  %s1775_s0 = inlined_call_operand.vmem [shape: f32[2,32,16], index: 0, kind: input, shape index: {}]   ;;  %s1776_s1 = inlined_call_operand.vmem [shape: f32[2,32], index: 1, kind: input, shape index: {}]   ;;  %s1777_s2 = inlined_call_operand.vmem [shape: f32[32,2], index: 2, kind: input, shape index: {}]   ;;  %s1778_s3 = inlined_call_operand.vmem [shape: f32[2,32,1], index: 3, kind: output, shape index: {}]  }
   0x1   :  { %s1436_s14 = smov 0  }
   0x2 LB: > { %s25_s15 = sadd.s32 1, %s1403_s13  ;;  %p1327_p0 = scmp.ge.s32.totalorder %s1407_s14, 1  ;;  %s1407_s14 = sphi %s1436_s14, %s13_s14   ;;  %s1403_s13 = sphi %s1434_s13, %s1780_s13   ;;  %s1399_s12 = sphi %s1432_s12, %s1779_s12  }
   0x3   : > { %p27_p1 = scmp.ge.s32.totalorder %s25_s15, 2  ;;  %p154_p2 = scmp.lt.s32.totalorder %s1407_s14, 3 }
   0x5   : > { %s1782_s15 = smov (%p27_p1, %s25_s15), 0  ;;  %p155_p3 = pnand %p1327_p0, %p154_p2 }
   0x6   : > { %p181_p4 = scmp.lt.s32.totalorder (!%p155_p3), %s1399_s12, 1 }
   0x7   : > { %158 = sbr.rel (%p155_p3) target bundleno = 833 (0x341), region = 32 }
   0xc   : > { %s1784_s12 = smov (!%p181_p4, %s1399_s12), 1  ;;  %vm205_vm0 = vcmask 130048   ;;  %v1409_v8 = vmov 0   ;;  %v222_v9 = vlaneseq  ;;  %v1410_v10 = vmov 1966171168   ;;  %v1488_v22 = vld [vmem:[%s1777_s2] sm:$0xff] }
   0xd   : > { %s1338_s16 = sshll.u32 %s1784_s12, 5  ;;  %1367 = vset.pattern.permute.xlu0 %v1409_v8  ;;  %1368 = vset.pattern.permute.xlu1 %v1409_v8  ;;  %v355_v11 = vunpack.c.l.s4 %v1410_v10  ;;  %vm198_vm1 = vcmask 253952   ;;  %vm569_vm2 = vcmask 130112   ;;  %vm576_vm3 = vcmask 195712  }
   0xe   : > { %s188_s19 = scalar_lea.vmem %s1775_s0, %s1338_s16  ;;  %v1459_v12 = vshrl.u32 %v222_v9, 7  ;;  %vm583_vm4 = vcmask 261312   ;;  %vm620_vm5 = vcmask 254976   ;;  %vm1173_vm6 = vcmask 1041409   ;;  %s193_s5 = scalar_lea.vmem %s1778_s3, %s1338_s16 }
   0xf   : > { %v200_v0 = vld [vmem:[%s188_s19] sm:$0xff]  ;;  %v201_v1 = vld [vmem:[%s188_s19 + $0x8] sm:$0xff]  ;;  %v202_v2 = vld [vmem:[%s188_s19 + $0x10] sm:$0xff]  ;;  %v356_v13 = vunpack.c.0.s8 %v355_v11  ;;  %vm1175_vm7 = vcmask 1042434   ;;  %vm1177_vm8 = vcmask 1043459   ;;  %vm1179_vm9 = vcmask 1044484  }
  0x10   : > { %v206_v3 = vsel %vm205_vm0, %v200_v0, 0.0  ;;  %v212_v4 = vsel %vm205_vm0, %v202_v2, 0.0  ;;  %v203_v5 = vld [vmem:[%s188_s19 + $0x18] sm:$0xff]  ;;  %v209_v6 = vsel %vm205_vm0, %v201_v1, 0.0  ;;  %v1462_v14 = vsub.s32 0, %v1459_v12 }
  0x11   : > { %207 = vadd.xlane.f32.xlu0 %v206_v3  ;;  %213 = vadd.xlane.f32.xlu1 %v212_v4  ;;  %v215_v7 = vsel %vm205_vm0, %v203_v5, 0.0  ;;  %v1465_v15 = vsub.s32 1, %v1459_v12  ;;  %v1468_v16 = vsub.s32 2, %v1459_v12  ;;  %v1471_v17 = vsub.s32 3, %v1459_v12 }
  0x12   : > { %v1474_v18 = vsub.s32 4, %v1459_v12  ;;  %v1477_v19 = vsub.s32 5, %v1459_v12  ;;  %v1480_v20 = vsub.s32 6, %v1459_v12  ;;  %v1483_v21 = vsub.s32 7, %v1459_v12 }
  0x13   : > { %v1491_v25 = vsub.s32 %v356_v13, %v1459_v12  ;;  %v632_v26 = vrot.slane %v1488_v22, %v1462_v14  ;;  %v639_v27 = vrot.slane %v1488_v22, %v1465_v15  ;;  %vm1181_vm10 = vcmask 1045509  }
  0x14   : > { %vm1183_vm11 = vcmask 1046534   ;;  %vm1185_vm12 = vcmask 1047559   ;;  %vm1212_vm13 = vcmask 15360   ;;  %vm1249_vm14 = vcmask 7168  }
  0x15   : > { %210 = vadd.xlane.f32.xlu0 %v209_v6  ;;  %216 = vadd.xlane.f32.xlu1 %v215_v7 }
  0x9a   : > { %v208_v23 = vpop.xlane.xlu0 %207  ;;  %v214_v24 = vpop.xlane.xlu1 %213 }
  0x9b   : > { %v225_v28 = vrot.slane %v208_v23, %v1462_v14  ;;  %v229_v29 = vrot.slane %v208_v23, %v1465_v15  ;;  %v233_v30 = vrot.slane %v208_v23, %v1468_v16  ;;  %v237_v31 = vrot.slane %v208_v23, %v1471_v17 }
  0x9c   : > { %v241_v32 = vrot.slane %v208_v23, %v1474_v18  ;;  %v245_v33 = vrot.slane %v208_v23, %v1477_v19  ;;  %v249_v34 = vrot.slane %v208_v23, %v1480_v20  ;;  %v253_v35 = vrot.slane %v208_v23, %v1483_v21 }
  0x9d   : > { %v350_v36 = vcombine.low %v225_v28, %v229_v29  ;;  %v351_v37 = vcombine.low %v233_v30, %v237_v31  ;;  %v289_v38 = vrot.slane %v214_v24, %v1462_v14  ;;  %v293_v39 = vrot.slane %v214_v24, %v1465_v15 }
  0x9e   : > { %v211_v40 = vpop.xlane.xlu0 %210  ;;  %v352_v41 = vcombine.low %v241_v32, %v245_v33  ;;  %v353_v42 = vcombine.low %v249_v34, %v253_v35  ;;  %v297_v43 = vrot.slane %v214_v24, %v1468_v16  ;;  %v301_v44 = vrot.slane %v214_v24, %v1471_v17  ;;  %v217_v1 = vpop.xlane.xlu1 %216 }
  0x9f   : > { %v360_v45 = vrot.slane %v350_v36, %v1491_v25  ;;  %v367_v46 = vrot.slane %v351_v37, %v1491_v25  ;;  %v257_v47 = vrot.slane %v211_v40, %v1462_v14  ;;  %v261_v48 = vrot.slane %v211_v40, %v1465_v15 }
  0xa0   : > { %v374_v49 = vrot.slane %v352_v41, %v1491_v25  ;;  %v381_v50 = vrot.slane %v353_v42, %v1491_v25  ;;  %v265_v51 = vrot.slane %v211_v40, %v1468_v16  ;;  %v269_v52 = vrot.slane %v211_v40, %v1471_v17 }
  0xa1   : > { %v382_v53 = vcombine.low %v360_v45, %v367_v46  ;;  %v273_v54 = vrot.slane %v211_v40, %v1474_v18  ;;  %v277_v55 = vrot.slane %v211_v40, %v1477_v19  ;;  %v281_v56 = vrot.slane %v211_v40, %v1480_v20 }
  0xa2   : > { %v383_v57 = vcombine.low %v374_v49, %v381_v50  ;;  %v285_v58 = vrot.slane %v211_v40, %v1483_v21  ;;  %v399_v59 = vcombine.low %v257_v47, %v261_v48  ;;  %v400_v60 = vcombine.low %v265_v51, %v269_v52 }
  0xa3   : > { %v390_v61 = vrot.slane %v382_v53, %v1491_v25  ;;  %v401_v62 = vcombine.low %v273_v54, %v277_v55  ;;  %v305_v63 = vrot.slane %v214_v24, %v1474_v18  ;;  %v309_v0 = vrot.slane %v214_v24, %v1477_v19  ;;  %v1554_v55 = vld [vmem:[%s1777_s2 + $0x8] sm:$0xff] }
  0xa4   : > { %v397_v2 = vrot.slane %v383_v57, %v1491_v25  ;;  %v402_v3 = vcombine.low %v281_v56, %v285_v58  ;;  %v409_v4 = vrot.slane %v399_v59, %v1491_v25  ;;  %v416_v5 = vrot.slane %v400_v60, %v1491_v25 }
  0xa5   : > { %v423_v6 = vrot.slane %v401_v62, %v1491_v25  ;;  %v313_v7 = vrot.slane %v214_v24, %v1480_v20  ;;  %v317_v8 = vrot.slane %v214_v24, %v1483_v21  ;;  %v448_v10 = vcombine.low %v289_v38, %v293_v39 }
  0xa6   : > { %v398_v11 = vcombine.low %v390_v61, %v397_v2  ;;  %v430_v13 = vrot.slane %v402_v3, %v1491_v25  ;;  %v431_v23 = vcombine.low %v409_v4, %v416_v5  ;;  %v449_v28 = vcombine.low %v297_v43, %v301_v44  ;;  %v612_v5 = vld [vmem:[%s1777_s2 + $0x18] sm:$0xff] }
  0xa7   : > { %v450_v29 = vcombine.low %v305_v63, %v309_v0  ;;  %v451_v30 = vcombine.low %v313_v7, %v317_v8  ;;  %v458_v31 = vrot.slane %v448_v10, %v1491_v25  ;;  %v321_v32 = vrot.slane %v217_v1, %v1462_v14 }
  0xa8   : > { %547 = vperm.xlu0 %1367, %v398_v11   ;;  %v432_v33 = vcombine.low %v423_v6, %v430_v13  ;;  %v439_v34 = vrot.slane %v431_v23, %v1491_v25  ;;  %v465_v35 = vrot.slane %v449_v28, %v1491_v25  ;;  %v325_v24 = vrot.slane %v217_v1, %v1465_v15 }
  0xa9   : > { %v472_v36 = vrot.slane %v450_v29, %v1491_v25  ;;  %v479_v37 = vrot.slane %v451_v30, %v1491_v25  ;;  %v329_v38 = vrot.slane %v217_v1, %v1468_v16  ;;  %v333_v39 = vrot.slane %v217_v1, %v1471_v17 }
  0xaa   : > { %v446_v40 = vrot.slane %v432_v33, %v1491_v25  ;;  %v480_v41 = vcombine.low %v458_v31, %v465_v35  ;;  %v337_v42 = vrot.slane %v217_v1, %v1474_v18  ;;  %v341_v43 = vrot.slane %v217_v1, %v1477_v19 }
  0xab   : > { %v481_v44 = vcombine.low %v472_v36, %v479_v37  ;;  %v345_v45 = vrot.slane %v217_v1, %v1480_v20  ;;  %v349_v46 = vrot.slane %v217_v1, %v1483_v21  ;;  %v497_v47 = vcombine.low %v321_v32, %v325_v24  ;;  %v611_v1 = vld [vmem:[%s1777_s2 + $0x10] sm:$0xff] }
  0xac   : > { %v447_v48 = vcombine.low %v439_v34, %v446_v40  ;;  %v488_v49 = vrot.slane %v480_v41, %v1491_v25  ;;  %v498_v50 = vcombine.low %v329_v38, %v333_v39  ;;  %v499_v51 = vcombine.low %v337_v42, %v341_v43  ;;  %634 = vbcast.lane.b32.xlu0 %v632_v26, 256 }
  0xad   : > { %v495_v52 = vrot.slane %v481_v44, %v1491_v25  ;;  %v500_v53 = vcombine.low %v345_v45, %v349_v46  ;;  %v507_v54 = vrot.slane %v497_v47, %v1491_v25  ;;  %v688_v26 = vrot.slane %v1554_v55, %v1462_v14 }
  0xae   : > { %550 = vperm.xlu1 %1368, %v447_v48   ;;  %v514_v56 = vrot.slane %v498_v50, %v1491_v25  ;;  %v521_v57 = vrot.slane %v499_v51, %v1491_v25  ;;  %v1411_v63 = vmov 0.0   ;;  %v751_v3 = vrot.slane %v611_v1, %v1465_v15 }
  0xaf   : > { %v496_v58 = vcombine.low %v488_v49, %v495_v52  ;;  %v528_v59 = vrot.slane %v500_v53, %v1491_v25  ;;  %199 = vst.msk [vmem:[#allocation2] sm:$0x1] %vm198_vm1, %v1411_v63  ;;  %v744_v4 = vrot.slane %v611_v1, %v1462_v14  ;;  %v758_v6 = vrot.slane %v611_v1, %v1468_v16 }
  0xb0   : > { %v529_v60 = vcombine.low %v507_v54, %v514_v56  ;;  %641 = vbcast.lane.b32.xlu0 %v639_v27, 256  ;;  %v695_v27 = vrot.slane %v1554_v55, %v1465_v15  ;;  %v800_v7 = vrot.slane %v612_v5, %v1462_v14  ;;  %v653_v8 = vrot.slane %v1488_v22, %v1471_v17 }
  0xb1   : > { %v530_v61 = vcombine.low %v521_v57, %v528_v59  ;;  %v807_v10 = vrot.slane %v612_v5, %v1465_v15  ;;  %v765_v11 = vrot.slane %v611_v1, %v1471_v17  ;;  %v646_v13 = vrot.slane %v1488_v22, %v1468_v16 }
  0xb2   : > { %553 = vperm.xlu1 %1368, %v496_v58   ;;  %v537_v62 = vrot.slane %v529_v60, %v1491_v25  ;;  %v660_v23 = vrot.slane %v1488_v22, %v1474_v18  ;;  %v702_v28 = vrot.slane %v1554_v55, %v1468_v16  ;;  %v772_v29 = vrot.slane %v611_v1, %v1474_v18 }
  0xb3   : > { %v544_v0 = vrot.slane %v530_v61, %v1491_v25  ;;  %v814_v15 = vrot.slane %v612_v5, %v1468_v16  ;;  %v667_v30 = vrot.slane %v1488_v22, %v1477_v19  ;;  %v709_v31 = vrot.slane %v1554_v55, %v1471_v17 }
  0xb4   : > { %690 = vbcast.lane.b32.xlu0 %v688_v26, 256  ;;  %v779_v32 = vrot.slane %v611_v1, %v1477_v19  ;;  %v821_v33 = vrot.slane %v612_v5, %v1471_v17  ;;  %v674_v34 = vrot.slane %v1488_v22, %v1480_v20  ;;  %v716_v16 = vrot.slane %v1554_v55, %v1474_v18  ;;  %v608_v26 = vld [vmem:[%s1776_s1] sm:$0x3] }
  0xb5   : > { %v545_v2 = vcombine.low %v537_v62, %v544_v0  ;;  %v786_v35 = vrot.slane %v611_v1, %v1480_v20  ;;  %v828_v24 = vrot.slane %v612_v5, %v1474_v18  ;;  %v681_v36 = vrot.slane %v1488_v22, %v1483_v21 }
  0xb6   : > { %v723_v17 = vrot.slane %v1554_v55, %v1477_v19  ;;  %v793_v37 = vrot.slane %v611_v1, %v1483_v21  ;;  %v835_v38 = vrot.slane %v612_v5, %v1477_v19  ;;  %v730_v39 = vrot.slane %v1554_v55, %v1480_v20  ;;  %v204_v57 = vld [vmem:[#allocation2] sm:$0x1] }
  0xb7   : > { %556 = vperm.xlu1 %1368, %v545_v2   ;;  %v842_v18 = vrot.slane %v612_v5, %v1480_v20  ;;  %v737_v22 = vrot.slane %v1554_v55, %v1483_v21  ;;  %v849_v40 = vrot.slane %v612_v5, %v1483_v21  ;;  %v559_v41 = vand.u32 127, %v222_v9 }
  0xb8   : > { %697 = vbcast.lane.b32.xlu0 %v695_v27, 256 }
  0xb9   : > { %v564_v42 = vadd.s32 4294967288, %v559_v41  ;;  %v571_v19 = vadd.s32 4294967280, %v559_v41  ;;  %v578_v45 = vadd.s32 4294967272, %v559_v41  ;;  %v1619_v20 = vsub.s32 %v559_v41, %v1459_v12 }
  0xbb   : > { %753 = vbcast.lane.b32.xlu1 %v751_v3, 256  ;;  %v567_v44 = vsub.s32 %v564_v42, %v1459_v12  ;;  %v574_v46 = vsub.s32 %v571_v19, %v1459_v12  ;;  %v581_v50 = vsub.s32 %v578_v45, %v1459_v12 }
  0xbc   : > { %746 = vbcast.lane.b32.xlu0 %v744_v4, 256 }
  0xbf   : > { %760 = vbcast.lane.b32.xlu1 %v758_v6, 256 }
  0xc0   : > { %802 = vbcast.lane.b32.xlu0 %v800_v7, 256 }
  0xc3   : > { %655 = vbcast.lane.b32.xlu1 %v653_v8, 256 }
  0xc4   : > { %809 = vbcast.lane.b32.xlu0 %v807_v10, 256 }
  0xc7   : > { %767 = vbcast.lane.b32.xlu1 %v765_v11, 256 }
  0xc8   : > { %648 = vbcast.lane.b32.xlu0 %v646_v13, 256 }
  0xcb   : > { %662 = vbcast.lane.b32.xlu1 %v660_v23, 256 }
  0xcc   : > { %704 = vbcast.lane.b32.xlu0 %v702_v28, 256 }
  0xcf   : > { %774 = vbcast.lane.b32.xlu1 %v772_v29, 256 }
  0xd0   : > { %816 = vbcast.lane.b32.xlu0 %v814_v15, 256 }
  0xd3   : > { %669 = vbcast.lane.b32.xlu1 %v667_v30, 256 }
  0xd4   : > { %711 = vbcast.lane.b32.xlu0 %v709_v31, 256 }
  0xd7   : > { %781 = vbcast.lane.b32.xlu1 %v779_v32, 256 }
  0xd8   : > { %823 = vbcast.lane.b32.xlu0 %v821_v33, 256 }
  0xdb   : > { %676 = vbcast.lane.b32.xlu1 %v674_v34, 256 }
  0xdc   : > { %718 = vbcast.lane.b32.xlu0 %v716_v16, 256 }
  0xdf   : > { %788 = vbcast.lane.b32.xlu1 %v786_v35, 256 }
  0xe0   : > { %830 = vbcast.lane.b32.xlu0 %v828_v24, 256 }
  0xe3   : > { %683 = vbcast.lane.b32.xlu1 %v681_v36, 256 }
  0xe4   : > { %725 = vbcast.lane.b32.xlu0 %v723_v17, 256 }
  0xe7   : > { %795 = vbcast.lane.b32.xlu1 %v793_v37, 256 }
  0xe8   : > { %837 = vbcast.lane.b32.xlu0 %v835_v38, 256 }
  0xec   : > { %732 = vbcast.lane.b32.xlu0 %v730_v39, 256 }
  0xf0   : > { %844 = vbcast.lane.b32.xlu0 %v842_v18, 256 }
  0xf4   : > { %739 = vbcast.lane.b32.xlu0 %v737_v22, 256 }
  0xf8   : > { %851 = vbcast.lane.b32.xlu0 %v849_v40, 256 }
 0x123   : > { %v548_v48 = vpop.permute.xlu0 %547 }
 0x124   : > { %v563_v9 = vrot.slane %v548_v48, %v1619_v20 }
 0x127   : > { %v635_v2 = vpop.permute.xlu0 %634 }
 0x129   : > { %v551_v43 = vpop.permute.xlu1 %550 }
 0x12a   : > { %v568_v49 = vrot.slane %v551_v43, %v567_v44 }
 0x12b   : > { %v642_v3 = vpop.permute.xlu0 %641 }
 0x12c   : > { %v570_v52 = vsel %vm569_vm2, %v568_v49, %v563_v9 }
 0x12d   : > { %v554_v47 = vpop.permute.xlu1 %553 }
 0x12e   : > { %v575_v21 = vrot.slane %v554_v47, %v574_v46 }
 0x12f   : > { %v691_v5 = vpop.permute.xlu0 %690 }
 0x130   : > { %v577_v54 = vsel %vm576_vm3, %v575_v21, %v570_v52 }
 0x132   : > { %v557_v51 = vpop.permute.xlu1 %556 }
 0x133   : > { %v582_v53 = vrot.slane %v557_v51, %v581_v50  ;;  %v698_v7 = vpop.permute.xlu0 %697 }
 0x135   : > { %v584_v55 = vsel %vm583_vm4, %v582_v53, %v577_v54 }
 0x136   : > { %v591_v56 = vrot.slane %v584_v55, %v1491_v25  ;;  %v754_v0 = vpop.permute.xlu1 %753 }
 0x137   : > { %v747_v10 = vpop.permute.xlu0 %746 }
 0x138   : > { %v598_v58 = vrot.slane %v591_v56, %v1491_v25 }
 0x13a   : > { %v600_v59 = vadd.f32 %v598_v58, %v204_v57  ;;  %v761_v1 = vpop.permute.xlu1 %760 }
 0x13b   : > { %v803_v13 = vpop.permute.xlu0 %802 }
 0x13c   : > { %602 = vst.msk [vmem:[#allocation2] sm:$0x1] %vm198_vm1, %v600_v59 }
 0x13e   : > { %v656_v27 = vpop.permute.xlu1 %655 }
 0x13f   : > { %v810_v23 = vpop.permute.xlu0 %809 }
 0x142   : > { %v768_v25 = vpop.permute.xlu1 %767 }
 0x143   : > { %v606_v12 = vld [vmem:[#allocation2] sm:$0x1]  ;;  %v649_v29 = vpop.permute.xlu0 %648 }
 0x144   : > { %v607_v60 = vmul.f32 0.0625, %v606_v12 }
 0x146   : > { %v617_v61 = vrot.slane %v607_v60, %v1462_v14  ;;  %v663_v4 = vpop.permute.xlu1 %662 }
 0x147   : > { %v705_v30 = vpop.permute.xlu0 %704 }
 0x148   : > { %v619_v62 = vmul.f32 %v617_v61, %v608_v26 }
 0x14a   : > { %v621_v63 = vsel %vm620_vm5, %v619_v62, 0.0  ;;  %v775_v6 = vpop.permute.xlu1 %774 }
 0x14b   : > { %622 = vadd.xlane.f32.xlu1 %v621_v63  ;;  %v817_v33 = vpop.permute.xlu0 %816 }
 0x14e   : > { %v670_v8 = vpop.permute.xlu1 %669 }
 0x14f   : > { %v712_v24 = vpop.permute.xlu0 %711 }
 0x152   : > { %v1630_v11 = vpop.permute.xlu1 %781 }
 0x153   : > { %v824_v39 = vpop.permute.xlu0 %823 }
 0x156   : > { %v1632_v14 = vpop.permute.xlu1 %676 }
 0x157   : > { %v719_v40 = vpop.permute.xlu0 %718 }
 0x15a   : > { %v1634_v28 = vpop.permute.xlu1 %788 }
 0x15b   : > { %v831_v44 = vpop.permute.xlu0 %830 }
 0x15e   : > { %v1636_v15 = vpop.permute.xlu1 %683 }
 0x15f   : > { %v726_v47 = vpop.permute.xlu0 %725 }
 0x162   : > { %v1638_v31 = vpop.permute.xlu1 %795 }
 0x163   : > { %v838_v9 = vpop.permute.xlu0 %837 }
 0x167   : > { %v733_v53 = vpop.permute.xlu0 %732 }
 0x16b   : > { %v845_v58 = vpop.permute.xlu0 %844 }
 0x16f   : > { %v740_v60 = vpop.permute.xlu0 %739 }
 0x1d4   : > { %v623_v32 = vpop.xlane.xlu1 %622 }
 0x1d5   : > { %v1640_v34 = vmax.f32 %v623_v32, 0.0 }
 0x1d7   : > { %v885_v16 = vmul.f32 %v635_v2, %v1640_v34  ;;  %v886_v35 = vmul.f32 %v642_v3, %v1640_v34  ;;  %v893_v36 = vmul.f32 %v691_v5, %v1640_v34  ;;  %v894_v17 = vmul.f32 %v698_v7, %v1640_v34 }
 0x1d8   : > { %v901_v37 = vmul.f32 %v747_v10, %v1640_v34  ;;  %v902_v38 = vmul.f32 %v754_v0, %v1640_v34  ;;  %v909_v18 = vmul.f32 %v803_v13, %v1640_v34  ;;  %v910_v22 = vmul.f32 %v810_v23, %v1640_v34  ;;  %v852_v0 = vpop.permute.xlu0 %851 }
 0x1d9   : > { %950 = vperm.xlu1 %1368, %v885_v16   ;;  %953 = vperm.xlu0 %1367, %v886_v35   ;;  %v887_v41 = vmul.f32 %v649_v29, %v1640_v34  ;;  %v895_v42 = vmul.f32 %v705_v30, %v1640_v34  ;;  %v903_v19 = vmul.f32 %v761_v1, %v1640_v34 }
 0x1da   : > { %v911_v43 = vmul.f32 %v817_v33, %v1640_v34  ;;  %v888_v45 = vmul.f32 %v656_v27, %v1640_v34  ;;  %v896_v46 = vmul.f32 %v712_v24, %v1640_v34  ;;  %v904_v48 = vmul.f32 %v768_v25, %v1640_v34 }
 0x1db   : > { %v912_v49 = vmul.f32 %v824_v39, %v1640_v34  ;;  %v889_v50 = vmul.f32 %v663_v4, %v1640_v34  ;;  %v897_v21 = vmul.f32 %v719_v40, %v1640_v34  ;;  %v905_v51 = vmul.f32 %v775_v6, %v1640_v34 }
 0x1dc   : > { %v913_v52 = vmul.f32 %v831_v44, %v1640_v34  ;;  %v890_v54 = vmul.f32 %v670_v8, %v1640_v34  ;;  %v898_v55 = vmul.f32 %v726_v47, %v1640_v34  ;;  %v906_v56 = vmul.f32 %v1630_v11, %v1640_v34 }
 0x1dd   : > { %974 = vperm.xlu1 %1368, %v893_v36   ;;  %977 = vperm.xlu0 %1367, %v894_v17   ;;  %v914_v57 = vmul.f32 %v838_v9, %v1640_v34  ;;  %v891_v59 = vmul.f32 %v1632_v14, %v1640_v34  ;;  %v899_v12 = vmul.f32 %v733_v53, %v1640_v34 }
 0x1de   : > { %v907_v26 = vmul.f32 %v1634_v28, %v1640_v34  ;;  %v915_v61 = vmul.f32 %v845_v58, %v1640_v34  ;;  %v892_v62 = vmul.f32 %v1636_v15, %v1640_v34  ;;  %v900_v63 = vmul.f32 %v740_v60, %v1640_v34 }
 0x1df   : > { %v908_v1 = vmul.f32 %v1638_v31, %v1640_v34  ;;  %v916_v27 = vmul.f32 %v852_v0, %v1640_v34 }
 0x1e1   : > { %998 = vperm.xlu1 %1368, %v901_v37   ;;  %1001 = vperm.xlu0 %1367, %v902_v38  }
 0x1e5   : > { %1022 = vperm.xlu1 %1368, %v909_v18   ;;  %1025 = vperm.xlu0 %1367, %v910_v22  }
 0x1e9   : > { %956 = vperm.xlu1 %1368, %v887_v41   ;;  %980 = vperm.xlu0 %1367, %v895_v42  }
 0x1ed   : > { %1004 = vperm.xlu1 %1368, %v903_v19   ;;  %1028 = vperm.xlu0 %1367, %v911_v43  }
 0x1f1   : > { %959 = vperm.xlu1 %1368, %v888_v45   ;;  %983 = vperm.xlu0 %1367, %v896_v46  }
 0x1f5   : > { %1007 = vperm.xlu1 %1368, %v904_v48   ;;  %1031 = vperm.xlu0 %1367, %v912_v49  }
 0x1f9   : > { %962 = vperm.xlu1 %1368, %v889_v50   ;;  %986 = vperm.xlu0 %1367, %v897_v21  }
 0x1fd   : > { %1010 = vperm.xlu1 %1368, %v905_v51   ;;  %1034 = vperm.xlu0 %1367, %v913_v52  }
 0x201   : > { %965 = vperm.xlu1 %1368, %v890_v54   ;;  %989 = vperm.xlu0 %1367, %v898_v55  }
 0x205   : > { %1013 = vperm.xlu1 %1368, %v906_v56   ;;  %1037 = vperm.xlu0 %1367, %v914_v57  }
 0x209   : > { %968 = vperm.xlu1 %1368, %v891_v59   ;;  %992 = vperm.xlu0 %1367, %v899_v12  }
 0x20d   : > { %1016 = vperm.xlu1 %1368, %v907_v26   ;;  %1040 = vperm.xlu0 %1367, %v915_v61  }
 0x211   : > { %971 = vperm.xlu1 %1368, %v892_v62   ;;  %995 = vperm.xlu0 %1367, %v900_v63  }
 0x215   : > { %1019 = vperm.xlu1 %1368, %v908_v1   ;;  %1043 = vperm.xlu0 %1367, %v916_v27  }
 0x254   : > { %v951_v2 = vpop.permute.xlu1 %950  ;;  %v954_v25 = vpop.permute.xlu0 %953 }
 0x255   : > { %v1048_v36 = vrot.slane %v951_v2, %v1619_v20  ;;  %v1052_v17 = vrot.slane %v954_v25, %v1619_v20 }
 0x257   : > { %v1174_v47 = vsel %vm1173_vm6, %v1052_v17, %v1048_v36 }
 0x258   : > { %v975_v3 = vpop.permute.xlu1 %974  ;;  %v978_v4 = vpop.permute.xlu0 %977 }
 0x259   : > { %v1080_v37 = vrot.slane %v975_v3, %v1619_v20  ;;  %v1084_v38 = vrot.slane %v978_v4, %v1619_v20 }
 0x25b   : > { %v1187_v48 = vsel %vm1173_vm6, %v1084_v38, %v1080_v37 }
 0x25c   : > { %v999_v5 = vpop.permute.xlu1 %998  ;;  %v1002_v6 = vpop.permute.xlu0 %1001 }
 0x25d   : > { %v1112_v39 = vrot.slane %v999_v5, %v1619_v20  ;;  %v1116_v18 = vrot.slane %v1002_v6, %v1619_v20 }
 0x25f   : > { %v1194_v50 = vsel %vm1173_vm6, %v1116_v18, %v1112_v39 }
 0x260   : > { %v1023_v7 = vpop.permute.xlu1 %1022  ;;  %v1026_v8 = vpop.permute.xlu0 %1025 }
 0x261   : > { %v1144_v22 = vrot.slane %v1023_v7, %v1619_v20  ;;  %v1148_v40 = vrot.slane %v1026_v8, %v1619_v20 }
 0x263   : > { %v1201_v21 = vsel %vm1173_vm6, %v1148_v40, %v1144_v22 }
 0x264   : > { %v957_v10 = vpop.permute.xlu1 %956  ;;  %v981_v11 = vpop.permute.xlu0 %980 }
 0x265   : > { %v1056_v42 = vrot.slane %v957_v10, %v1619_v20  ;;  %v1088_v19 = vrot.slane %v981_v11, %v1619_v20 }
 0x267   : > { %v1176_v53 = vsel %vm1175_vm7, %v1056_v42, %v1174_v47  ;;  %v1188_v54 = vsel %vm1175_vm7, %v1088_v19, %v1187_v48 }
 0x268   : > { %v1005_v13 = vpop.permute.xlu1 %1004  ;;  %v1029_v14 = vpop.permute.xlu0 %1028 }
 0x269   : > { %v1120_v44 = vrot.slane %v1005_v13, %v1619_v20  ;;  %v1152_v45 = vrot.slane %v1029_v14, %v1619_v20 }
 0x26b   : > { %v1195_v58 = vsel %vm1175_vm7, %v1120_v44, %v1194_v50  ;;  %v1202_v59 = vsel %vm1175_vm7, %v1152_v45, %v1201_v21 }
 0x26c   : > { %v960_v23 = vpop.permute.xlu1 %959  ;;  %v984_v28 = vpop.permute.xlu0 %983 }
 0x26d   : > { %v1060_v46 = vrot.slane %v960_v23, %v1619_v20  ;;  %v1092_v49 = vrot.slane %v984_v28, %v1619_v20 }
 0x26f   : > { %v1178_v12 = vsel %vm1177_vm8, %v1060_v46, %v1176_v53  ;;  %v1189_v26 = vsel %vm1177_vm8, %v1092_v49, %v1188_v54 }
 0x270   : > { %v1679_v29 = vpop.permute.xlu1 %1007  ;;  %v1681_v15 = vpop.permute.xlu0 %1031 }
 0x271   : > { %v1124_v61 = vrot.slane %v1679_v29, %v1619_v20  ;;  %v1156_v62 = vrot.slane %v1681_v15, %v1619_v20 }
 0x273   : > { %v1196_v14 = vsel %vm1177_vm8, %v1124_v61, %v1195_v58  ;;  %v1203_v15 = vsel %vm1177_vm8, %v1156_v62, %v1202_v59 }
 0x274   : > { %v963_v30 = vpop.permute.xlu1 %962  ;;  %v987_v31 = vpop.permute.xlu0 %986 }
 0x275   : > { %v1064_v9 = vrot.slane %v963_v30, %v1619_v20  ;;  %v1096_v51 = vrot.slane %v987_v31, %v1619_v20 }
 0x277   : > { %v1180_v0 = vsel %vm1179_vm9, %v1064_v9, %v1178_v12  ;;  %v1190_v1 = vsel %vm1179_vm9, %v1096_v51, %v1189_v26 }
 0x278   : > { %v1683_v32 = vpop.permute.xlu1 %1010  ;;  %v1685_v33 = vpop.permute.xlu0 %1034 }
 0x279   : > { %v1128_v27 = vrot.slane %v1683_v32, %v1619_v20  ;;  %v1160_v2 = vrot.slane %v1685_v33, %v1619_v20 }
 0x27b   : > { %v1197_v30 = vsel %vm1179_vm9, %v1128_v27, %v1196_v14 }
 0x27c   : > { %v966_v34 = vpop.permute.xlu1 %965  ;;  %v990_v16 = vpop.permute.xlu0 %989 }
 0x27d   : > { %v1068_v55 = vrot.slane %v966_v34, %v1619_v20  ;;  %v1100_v56 = vrot.slane %v990_v16, %v1619_v20  ;;  %v1204_v34 = vsel %vm1179_vm9, %v1160_v2, %v1203_v15 }
 0x27f   : > { %v1182_v3 = vsel %vm1181_vm10, %v1068_v55, %v1180_v0  ;;  %v1191_v4 = vsel %vm1181_vm10, %v1100_v56, %v1190_v1 }
 0x280   : > { %v1687_v35 = vpop.permute.xlu1 %1013  ;;  %v1689_v24 = vpop.permute.xlu0 %1037 }
 0x281   : > { %v1132_v5 = vrot.slane %v1687_v35, %v1619_v20  ;;  %v1164_v8 = vrot.slane %v1689_v24, %v1619_v20 }
 0x283   : > { %v1198_v16 = vsel %vm1181_vm10, %v1132_v5, %v1197_v30  ;;  %v1205_v17 = vsel %vm1181_vm10, %v1164_v8, %v1204_v34 }
 0x284   : > { %v969_v41 = vpop.permute.xlu1 %968  ;;  %v993_v43 = vpop.permute.xlu0 %992 }
 0x285   : > { %v1072_v60 = vrot.slane %v969_v41, %v1619_v20  ;;  %v1104_v63 = vrot.slane %v993_v43, %v1619_v20 }
 0x287   : > { %v1184_v13 = vsel %vm1183_vm11, %v1072_v60, %v1182_v3  ;;  %v1192_v29 = vsel %vm1183_vm11, %v1104_v63, %v1191_v4 }
 0x288   : > { %v1017_v52 = vpop.permute.xlu1 %1016  ;;  %v1041_v57 = vpop.permute.xlu0 %1040 }
 0x289   : > { %v1136_v10 = vrot.slane %v1017_v52, %v1619_v20  ;;  %v1168_v23 = vrot.slane %v1041_v57, %v1619_v20 }
 0x28b   : > { %v1199_v38 = vsel %vm1183_vm11, %v1136_v10, %v1198_v16  ;;  %v1206_v18 = vsel %vm1183_vm11, %v1168_v23, %v1205_v17 }
 0x28c   : > { %v972_v25 = vpop.permute.xlu1 %971  ;;  %v996_v7 = vpop.permute.xlu0 %995 }
 0x28d   : > { %v1076_v6 = vrot.slane %v972_v25, %v1619_v20  ;;  %v1108_v11 = vrot.slane %v996_v7, %v1619_v20 }
 0x28f   : > { %v1186_v28 = vsel %vm1185_vm12, %v1076_v6, %v1184_v13  ;;  %v1193_v33 = vsel %vm1185_vm12, %v1108_v11, %v1192_v29 }
 0x290   : > { %v1020_v31 = vpop.permute.xlu1 %1019  ;;  %v1213_v32 = vsel %vm1212_vm13, %v1186_v28, 0.0  ;;  %v1044_v24 = vpop.permute.xlu0 %1043  ;;  %v1216_v36 = vsel %vm1212_vm13, %v1193_v33, 0.0 }
 0x291   : > { %v1140_v35 = vrot.slane %v1020_v31, %v1619_v20  ;;  %1214 = vadd.xlane.f32.xlu1 %v1213_v32  ;;  %v1172_v37 = vrot.slane %v1044_v24, %v1619_v20  ;;  %1217 = vadd.xlane.f32.xlu0 %v1216_v36 }
 0x293   : > { %v1200_v39 = vsel %vm1185_vm12, %v1140_v35, %v1199_v38  ;;  %v1207_v40 = vsel %vm1185_vm12, %v1172_v37, %v1206_v18 }
 0x294   : > { %v1219_v22 = vsel %vm1212_vm13, %v1200_v39, 0.0  ;;  %v1222_v41 = vsel %vm1212_vm13, %v1207_v40, 0.0 }
 0x295   : > { %1220 = vadd.xlane.f32.xlu0 %v1219_v22  ;;  %1223 = vadd.xlane.f32.xlu1 %v1222_v41 }
 0x31a   : > { %v1215_v42 = vpop.xlane.xlu1 %1214  ;;  %v1218_v43 = vpop.xlane.xlu0 %1217 }
 0x31b   : > { %v1332_v19 = vmul.f32 -1.442695, %v1215_v42  ;;  %v1333_v44 = vmul.f32 -1.442695, %v1218_v43 }
 0x31d   : > { %1369 = vpow2.f32 %v1332_v19 }
 0x31e   : > { %1371 = vpow2.f32 %v1333_v44  ;;  %v1224_v20 = vpop.xlane.xlu1 %1223  ;;  %v1221_v45 = vpop.xlane.xlu0 %1220 }
 0x31f   : > { %v1335_v46 = vmul.f32 -1.442695, %v1224_v20  ;;  %v1334_v47 = vmul.f32 -1.442695, %v1221_v45 }
 0x321   : > { %1373 = vpow2.f32 %v1335_v46 }
 0x322   : > { %1375 = vpow2.f32 %v1334_v47 }
 0x32a   : > { %v1370_v48 = vpop.eup %1369 }
 0x32b   : > { %v1372_v49 = vpop.eup %1371  ;;  %v1237_v50 = vadd.f32 1.0, %v1370_v48 }
 0x32c   : > { %v1238_v21 = vadd.f32 1.0, %v1372_v49 }
 0x32d   : > { %1377 = vrcp.f32 %v1237_v50 }
 0x32e   : > { %1379 = vrcp.f32 %v1238_v21  ;;  %v1374_v9 = vpop.eup %1373 }
 0x32f   : > { %v1376_v51 = vpop.eup %1375  ;;  %v1240_v52 = vadd.f32 1.0, %v1374_v9 }
 0x330   : > { %v1239_v53 = vadd.f32 1.0, %v1376_v51 }
 0x331   : > { %1381 = vrcp.f32 %v1240_v52 }
 0x332   : > { %1383 = vrcp.f32 %v1239_v53 }
 0x33a   : > { %v1378_v54 = vpop.eup %1377 }
 0x33b   : > { %v1380_v55 = vpop.eup %1379  ;;  %1250 = vst.msk [vmem:[%s193_s5] sm:$0xff] %vm1249_vm14, %v1378_v54 }
 0x33c   : > { %1251 = vst.msk [vmem:[%s193_s5 + $0x8] sm:$0xff] %vm1249_vm14, %v1380_v55 }
 0x33e   : > { %v1382_v56 = vpop.eup %1381 }
 0x33f   : > { %v1384_v57 = vpop.eup %1383  ;;  %1253 = vst.msk [vmem:[%s193_s5 + $0x18] sm:$0xff] %vm1249_vm14, %v1382_v56 }
 0x340   : > { %1252 = vst.msk [vmem:[%s193_s5 + $0x10] sm:$0xff] %vm1249_vm14, %v1384_v57 }
 0x341 PF: > { %s13_s14 = sadd.s32 1, %s1407_s14   ;;  %s1779_s12 = smov %s1403_s13 }
 0x342   : > { %p10_p5 = scmp.ge.s32.totalorder %s13_s14, 4   ;;  %s1780_s13 = smov %s1782_s15 }
 0x344   :  { %12 = sbr.rel (!%p10_p5) target bundleno = 2 (0x2), region = 70 }

</bundles_post_ra>
